<compile_context>
chip_gen: v7x
topology: tpu7x:2x2x1
jax: 0.10.0
libtpu: 0.0.40
codegen_flags: <defaults>
</compile_context>

<pallas_src>
import jax
import jax.numpy as jnp
import numpy as np
from jax import lax
from jax.experimental import pallas as pl
from jax.experimental.pallas import tpu as pltpu

# ---- "args" of the PyTorch module (static, baked into the kernels) ----------
ADV_TEMP = 1.0            # args.adv_temp
REGULARIZATION = 1e-3     # args.regularization
USE_WEIGHT = True         # args.use_weight
MODEL_NAME = "ComplEx"    # args.model_name (triggers L3 regularization branch)

_L3_MODELS = ("ComplEx", "DistMult", "BoxE", "SimplE")

_VMEM_LIMIT = 32 * 1024 * 1024     # explicit scoped-VMEM limit (fits all gens)
_TILE_BUDGET = 20 << 20            # bytes budgeted for tiles + temporaries
_MAX_TILE_ROWS = 4096              # amortize per-step overhead (>= 1 MiB tiles)


def _bce_with_logits(x, y):
    # PyTorch BCEWithLogitsLoss(reduction='none') stable form:
    #   max(x, 0) - x * y + log(1 + exp(-|x|))
    return jnp.maximum(x, 0.0) - x * y + jnp.log1p(jnp.exp(-jnp.abs(x)))


# ------------------------------ tiling helpers --------------------------------
def _sublane_multiple(dtype):
    # f32 -> 8, bf16 -> 16, int8 -> 32 sublane packing.
    return max(8, 32 // jnp.dtype(dtype).itemsize)


def _pick_tile_rows(total, cap, mult):
    if total <= mult:
        return total                       # one block equal to the full dim
    cap = max(mult, (cap // mult) * mult)
    return min(cap, (total // mult) * mult)


def _choose_tb(B, N, dtypes, mult):
    neg_dt, lab_dt, w_dt = (jnp.dtype(d) for d in dtypes)
    # double-buffered input tiles + ~4 f32 tile-sized temporaries + acc row.
    in_bytes = N * (neg_dt.itemsize + lab_dt.itemsize) + 128 * w_dt.itemsize
    per_row = 2 * in_bytes + 4 * N * 4 + 128 * 4
    cap = min(_MAX_TILE_ROWS, max(1, _TILE_BUDGET // per_row))
    return _pick_tile_rows(B, cap, mult)


def _choose_tr(R, D, dtype, mult):
    lane_pad = -(-D // 128) * 128
    per_row = 2 * lane_pad * jnp.dtype(dtype).itemsize + 2 * lane_pad * 4
    cap = min(_MAX_TILE_ROWS, max(1, _TILE_BUDGET // per_row))
    return _pick_tile_rows(R, cap, mult)


def _core_split(n_tiles):
    """Split row tiles over the (up to) 2 TensorCores of a v7x chip."""
    ncores = 2 if n_tiles >= 2 else 1
    tpc = pl.cdiv(n_tiles, ncores)
    if ncores * tpc == n_tiles:
        blk = lambda c, i: (c * tpc + i, 0)
    else:
        # Overflow tiles of the last core are clamped (re-read the last real
        # tile) and fully masked out inside the kernel via the row index.
        blk = lambda c, i: (jnp.minimum(c * tpc + i, n_tiles - 1), 0)
    return ncores, tpc, blk


# --------------------------- main (B, N) reduction -----------------------------
def _adv_neg_weighted_sum(neg_score, neg_label, weight, max_tile_rows=None):
    """sum_b w_b * sum_j softmax(adv_temp * x)_bj * BCE(x, y)_bj  (scalar)."""
    B, N = neg_score.shape
    mult = max(_sublane_multiple(neg_score.dtype),
               _sublane_multiple(neg_label.dtype),
               _sublane_multiple(weight.dtype))
    tb = _choose_tb(B, N, (neg_score.dtype, neg_label.dtype, weight.dtype), mult)
    if max_tile_rows is not None:
        tb = min(tb, max(mult, (max_tile_rows // mult) * mult))
    n_tiles = pl.cdiv(B, tb)
    ncores, tpc, blk = _core_split(n_tiles)

    def kernel(neg_ref, lab_ref, w_ref, out_ref):
        c = pl.program_id(0)
        i = pl.program_id(1)

        @pl.when(i == 0)
        def _():
            out_ref[...] = jnp.zeros_like(out_ref)

        x = neg_ref[...].astype(jnp.float32)          # (tb, N), upcast in VMEM
        y = lab_ref[...].astype(jnp.float32)          # (tb, N)
        w = w_ref[...].astype(jnp.float32)            # (tb, 1)

        # Self-adversarial softmax weights (detached); algebraic form
        # sum(e*bce)/sum(e) -> one divide per row.
        s = x if ADV_TEMP == 1.0 else x * ADV_TEMP
        m = jnp.max(s, axis=1, keepdims=True)
        e = jnp.exp(s - m)

        bce = jnp.maximum(x, 0.0) - x * y + jnp.log1p(jnp.exp(-jnp.abs(x)))
        num = jnp.sum(e * bce, axis=1, keepdims=True)
        den = jnp.sum(e, axis=1, keepdims=True)
        neg_loss = num / den                          # (tb, 1)

        # Mask rows beyond B (ragged last tile / clamped overflow tiles);
        # jnp.where blocks NaN/Inf from the padded region.
        tile = c * tpc + i
        rows = tile * tb + lax.broadcasted_iota(jnp.int32, (tb, 1), 0)
        contrib = jnp.where(rows < B, w * neg_loss, 0.0)

        # Loop-carried dep is a plain VPU add on per-row partials.
        out_ref[...] += contrib

    out = pl.pallas_call(
        kernel,
        out_shape=jax.ShapeDtypeStruct((ncores * tb, 1), jnp.float32),
        grid=(ncores, tpc),
        in_specs=[pl.BlockSpec((tb, N), blk),
                  pl.BlockSpec((tb, N), blk),
                  pl.BlockSpec((tb, 1), blk)],
        out_specs=pl.BlockSpec((tb, 1), lambda c, i: (c, 0)),
        compiler_params=pltpu.CompilerParams(
            dimension_semantics=("parallel", "arbitrary"),
            vmem_limit_bytes=_VMEM_LIMIT),
    )(neg_score, neg_label, weight)
    return jnp.sum(out)      # tiny (ncores*tb, 1) reduction in XLA


# ------------------------------ L3 regularizer --------------------------------
def _l3_cubed_sum(table, max_tile_rows=None):
    """sum(|table|^3) streamed over the native (R, D) layout."""
    R, D = table.shape
    mult = _sublane_multiple(table.dtype)
    tr = _choose_tr(R, D, table.dtype, mult)
    if max_tile_rows is not None:
        tr = min(tr, max(mult, (max_tile_rows // mult) * mult))
    n_tiles = pl.cdiv(R, tr)
    ncores, tpc, blk = _core_split(n_tiles)

    def kernel(w_ref, out_ref):
        c = pl.program_id(0)
        i = pl.program_id(1)

        @pl.when(i == 0)
        def _():
            out_ref[...] = jnp.zeros_like(out_ref)

        w = w_ref[...].astype(jnp.float32)            # (tr, D), upcast in VMEM
        cubed = w * w * jnp.abs(w)                    # |w|^3 without pow

        tile = c * tpc + i
        rows = tile * tr + lax.broadcasted_iota(jnp.int32, (tr, 1), 0)
        cubed = jnp.where(rows < R, cubed, 0.0)       # NaN-safe tail mask

        # Lane-dense (1, D) partial per core; collapse to a scalar in the wrapper.
        out_ref[...] += jnp.sum(cubed, axis=0, keepdims=True)[None]

    out = pl.pallas_call(
        kernel,
        out_shape=jax.ShapeDtypeStruct((ncores, 1, D), jnp.float32),
        grid=(ncores, tpc),
        in_specs=[pl.BlockSpec((tr, D), blk)],
        out_specs=pl.BlockSpec((1, 1, D), lambda c, i: (c, 0, 0)),
        compiler_params=pltpu.CompilerParams(
            dimension_semantics=("parallel", "arbitrary"),
            vmem_limit_bytes=_VMEM_LIMIT),
    )(table)
    return jnp.sum(out)


# ---------------------------------- wrapper ------------------------------------
def adv_bce_loss(pos_score, neg_score, neg_label, subsampling_weight,
                 ent_emb, rel_emb, *, max_tile_rows=None):
    B = neg_score.shape[0]
    if USE_WEIGHT:
        w = subsampling_weight.reshape(B, 1)
    else:
        # mean == sum(1 * loss) / sum(1): same fused kernel with unit weights.
        w = jnp.ones((B, 1), jnp.float32)

    # Dominant (B, N) stream through the Pallas kernel (native dtypes).
    wneg = _adv_neg_weighted_sum(neg_score, neg_label, w,
                                 max_tile_rows=max_tile_rows)

    # Positive-sample term and sum(w) are O(B): plain XLA (perf review item 10).
    wf = w.reshape(B).astype(jnp.float32)
    px = pos_score.reshape(B).astype(jnp.float32)
    pos_loss = jnp.maximum(px, 0.0) - px + jnp.log1p(jnp.exp(-jnp.abs(px)))
    wpos = jnp.sum(wf * pos_loss)
    wsum = jnp.sum(wf)

    loss = (wpos + wneg) / (2.0 * wsum)
    if MODEL_NAME in _L3_MODELS:
        reg = (_l3_cubed_sum(ent_emb, max_tile_rows=max_tile_rows)
               + _l3_cubed_sum(rel_emb, max_tile_rows=max_tile_rows))
        loss = loss + REGULARIZATION * reg
    return loss


# --------------------------- pure-JAX reference --------------------------------
def adv_bce_loss_ref(pos_score, neg_score, neg_label, subsampling_weight,
                     ent_emb, rel_emb):
    p = jax.nn.softmax(neg_score * ADV_TEMP, axis=1)
    neg_loss = jnp.sum(p * _bce_with_logits(neg_score, neg_label), axis=1)
    pos_loss = _bce_with_logits(pos_score, jnp.ones_like(pos_score))[:, 0]
    if USE_WEIGHT:
        w_sum = jnp.sum(subsampling_weight)
        pos_l = jnp.sum(subsampling_weight * pos_loss) / w_sum
        neg_l = jnp.sum(subsampling_weight * neg_loss) / w_sum
    else:
        pos_l = jnp.mean(pos_loss)
        neg_l = jnp.mean(neg_loss)
    loss = (pos_l + neg_l) / 2.0
    if MODEL_NAME in _L3_MODELS:
        loss = loss + REGULARIZATION * (jnp.sum(jnp.abs(ent_emb) ** 3)
                                        + jnp.sum(jnp.abs(rel_emb) ** 3))
    return loss


if __name__ == "__main__":
    key = jax.random.PRNGKey(0)
    kp, kn, kl, kw, ke, kr = jax.random.split(key, 6)

    # Small shapes, chosen so the multi-tile / 2-core / ragged-tail paths run:
    # B=160 with 64-row tiles -> 3 tiles, 2 "cores", clamped overflow tile;
    # ent table 300 rows -> ragged last tile; rel table 40 rows -> single tile.
    B, N = 160, 256
    NUM_ENT, NUM_REL, D = 300, 40, 96

    pos_score = jax.random.normal(kp, (B, 1), dtype=jnp.float32)
    neg_score = jax.random.normal(kn, (B, N), dtype=jnp.float32)
    neg_label = (jax.random.uniform(kl, (B, N)) < 0.1).astype(jnp.float32)
    subsampling_weight = jax.random.uniform(kw, (B,), minval=0.1, maxval=1.0,
                                            dtype=jnp.float32)
    # deterministic synthetic embedding tables (model.ent_emb / model.rel_emb)
    ent_emb = 0.1 * jax.random.normal(ke, (NUM_ENT, D), dtype=jnp.float32)
    rel_emb = 0.1 * jax.random.normal(kr, (NUM_REL, D), dtype=jnp.float32)

    loss = adv_bce_loss(pos_score, neg_score, neg_label, subsampling_weight,
                        ent_emb, rel_emb, max_tile_rows=64)
    loss = jax.block_until_ready(loss)

    ref = adv_bce_loss_ref(pos_score, neg_score, neg_label, subsampling_weight,
                           ent_emb, rel_emb)
    np.testing.assert_allclose(np.asarray(loss), np.asarray(ref),
                               rtol=1e-5, atol=1e-6)
    print("KERNEL_OK")
</pallas_src>

<mosaic_0001>
module attributes {stable_mosaic.version = 11 : i64} {
  func.func @kernel(%arg0: i32, %arg1: i32, %arg2: memref<64x256xf32, #tpu.memory_space<vmem>>, %arg3: memref<64x256xf32, #tpu.memory_space<vmem>>, %arg4: memref<64x1xf32, #tpu.memory_space<vmem>>, %arg5: memref<64x1xf32, #tpu.memory_space<vmem>>) attributes {dimension_semantics = [#tpu.dimension_semantics<parallel>, #tpu.dimension_semantics<arbitrary>], iteration_bounds = array<i64: 2, 2>, scalar_prefetch = 0 : i64, scratch_operands = 0 : i64, tpu.core_type = #tpu.core_type<tc>, window_params = [{transform_indices = @transform_0, window_bounds = array<i64: 64, 256>}, {transform_indices = @transform_1, window_bounds = array<i64: 64, 256>}, {transform_indices = @transform_2, window_bounds = array<i64: 64, 1>}, {transform_indices = @transform_3, window_bounds = array<i64: 64, 1>}]} {
    %c0_i32 = arith.constant 0 : i32
    %0 = arith.cmpi eq, %arg1, %c0_i32 : i32
    %1 = arith.extui %0 : i1 to i32
    %c0_i32_0 = arith.constant 0 : i32
    %2 = arith.cmpi ne, %1, %c0_i32_0 : i32
    scf.if %2 {
      %cst_15 = arith.constant 0.000000e+00 : f32
      %41 = vector.broadcast %cst_15 : f32 to vector<64x1xf32>
      %c0_16 = arith.constant 0 : index
      %c0_17 = arith.constant 0 : index
      %42 = vector.load %arg5[%c0_16, %c0_17] : memref<64x1xf32, #tpu.memory_space<vmem>>, vector<64x1xf32>
      tpu.vector_store %arg5[%c0_16, %c0_17], %41 {strides = array<i32>} : memref<64x1xf32, #tpu.memory_space<vmem>>, vector<64x1xf32>,
    } else {
    }
    %c0 = arith.constant 0 : index
    %c0_1 = arith.constant 0 : index
    %3 = vector.load %arg2[%c0, %c0_1] : memref<64x256xf32, #tpu.memory_space<vmem>>, vector<64x256xf32>
    %c0_2 = arith.constant 0 : index
    %c0_3 = arith.constant 0 : index
    %4 = vector.load %arg3[%c0_2, %c0_3] : memref<64x256xf32, #tpu.memory_space<vmem>>, vector<64x256xf32>
    %c0_4 = arith.constant 0 : index
    %c0_5 = arith.constant 0 : index
    %5 = vector.load %arg4[%c0_4, %c0_5] : memref<64x1xf32, #tpu.memory_space<vmem>>, vector<64x1xf32>
    %cst = arith.constant dense<0xFF800000> : vector<64xf32>
    %6 = vector.multi_reduction <maximumf>, %3, %cst [1] : vector<64x256xf32> to vector<64xf32>
    %7 = vector.shape_cast %6 : vector<64xf32> to vector<64x1xf32>
    %8 = vector.broadcast %7 : vector<64x1xf32> to vector<64x256xf32>
    %9 = arith.subf %3, %8 : vector<64x256xf32>
    %10 = math.exp %9 : vector<64x256xf32>
    %cst_6 = arith.constant 0.000000e+00 : f32
    %11 = vector.broadcast %cst_6 : f32 to vector<64x256xf32>
    %12 = arith.maximumf %3, %11 : vector<64x256xf32>
    %13 = arith.mulf %3, %4 : vector<64x256xf32>
    %14 = arith.subf %12, %13 : vector<64x256xf32>
    %15 = math.absf %3 : vector<64x256xf32>
    %cst_7 = arith.constant 0.000000e+00 : f32
    %16 = vector.broadcast %cst_7 : f32 to vector<64x256xf32>
    %17 = arith.subf %16, %15 : vector<64x256xf32>
    %18 = math.exp %17 : vector<64x256xf32>
    %19 = math.log1p %18 : vector<64x256xf32>
    %20 = arith.addf %14, %19 : vector<64x256xf32>
    %21 = arith.mulf %10, %20 : vector<64x256xf32>
    %cst_8 = arith.constant dense<0.000000e+00> : vector<64xf32>
    %22 = vector.multi_reduction <add>, %21, %cst_8 [1] : vector<64x256xf32> to vector<64xf32>
    %23 = vector.shape_cast %22 : vector<64xf32> to vector<64x1xf32>
    %cst_9 = arith.constant dense<0.000000e+00> : vector<64xf32>
    %24 = vector.multi_reduction <add>, %10, %cst_9 [1] : vector<64x256xf32> to vector<64xf32>
    %25 = vector.shape_cast %24 : vector<64xf32> to vector<64x1xf32>
    %26 = arith.divf %23, %25 : vector<64x1xf32>
    %c2_i32 = arith.constant 2 : i32
    %27 = arith.muli %arg0, %c2_i32 : i32
    %28 = arith.addi %27, %arg1 : i32
    %c64_i32 = arith.constant 64 : i32
    %29 = arith.muli %28, %c64_i32 : i32
    %30 = tpu.iota {dimensions = array<i32: 0>} : vector<64x1xi32>
    %31 = vector.broadcast %29 : i32 to vector<64x1xi32>
    %32 = arith.addi %31, %30 : vector<64x1xi32>
    %c160_i32 = arith.constant 160 : i32
    %33 = vector.broadcast %c160_i32 : i32 to vector<64x1xi32>
    %34 = arith.cmpi slt, %32, %33 : vector<64x1xi32>
    %35 = arith.mulf %5, %26 : vector<64x1xf32>
    %cst_10 = arith.constant 0.000000e+00 : f32
    %36 = vector.broadcast %cst_10 : f32 to vector<64x1xf32>
    %37 = arith.select %34, %35, %36 : vector<64x1xi1>, vector<64x1xf32>
    %c0_11 = arith.constant 0 : index
    %c0_12 = arith.constant 0 : index
    %38 = vector.load %arg5[%c0_11, %c0_12] : memref<64x1xf32, #tpu.memory_space<vmem>>, vector<64x1xf32>
    %39 = arith.addf %38, %37 : vector<64x1xf32>
    %c0_13 = arith.constant 0 : index
    %c0_14 = arith.constant 0 : index
    %40 = vector.load %arg5[%c0_13, %c0_14] : memref<64x1xf32, #tpu.memory_space<vmem>>, vector<64x1xf32>
    tpu.vector_store %arg5[%c0_13, %c0_14], %39 {strides = array<i32>} : memref<64x1xf32, #tpu.memory_space<vmem>>, vector<64x1xf32>,
    return
  }
  func.func @transform_0(%arg0: i32, %arg1: i32) -> (i32, i32) {
    %c2_i32 = arith.constant 2 : i32
    %0 = arith.muli %arg0, %c2_i32 : i32
    %1 = arith.addi %0, %arg1 : i32
    %c2_i32_0 = arith.constant 2 : i32
    %2 = arith.minsi %1, %c2_i32_0 : i32
    %c0_i32 = arith.constant 0 : i32
    %c0_i32_1 = arith.constant 0 : i32
    return %2, %c0_i32 : i32, i32
  }
  func.func @transform_1(%arg0: i32, %arg1: i32) -> (i32, i32) {
    %c2_i32 = arith.constant 2 : i32
    %0 = arith.muli %arg0, %c2_i32 : i32
    %1 = arith.addi %0, %arg1 : i32
    %c2_i32_0 = arith.constant 2 : i32
    %2 = arith.minsi %1, %c2_i32_0 : i32
    %c0_i32 = arith.constant 0 : i32
    %c0_i32_1 = arith.constant 0 : i32
    return %2, %c0_i32 : i32, i32
  }
  func.func @transform_2(%arg0: i32, %arg1: i32) -> (i32, i32) {
    %c2_i32 = arith.constant 2 : i32
    %0 = arith.muli %arg0, %c2_i32 : i32
    %1 = arith.addi %0, %arg1 : i32
    %c2_i32_0 = arith.constant 2 : i32
    %2 = arith.minsi %1, %c2_i32_0 : i32
    %c0_i32 = arith.constant 0 : i32
    %c0_i32_1 = arith.constant 0 : i32
    return %2, %c0_i32 : i32, i32
  }
  func.func @transform_3(%arg0: i32, %arg1: i32) -> (i32, i32) {
    %c0_i32 = arith.constant 0 : i32
    %c0_i32_0 = arith.constant 0 : i32
    return %arg0, %c0_i32 : i32, i32
  }
}

</mosaic_0001>

<bundles_post_ra>
// kernel: tpu_custom_call.1
= control target key start
LH: loop header
LB: loop body
LE: loop exit
PB: predicated region body
PF: predicated region fallthrough
CT: control target
= control target key end

     0   :  { %8 = vsyncpa [#allocation3], 0  ;;  %s2187_s0 = inlined_call_operand.hbm [shape: f32[160,256], index: 0, kind: input, shape index: {}]   ;;  %s2188_s1 = inlined_call_operand.hbm [shape: f32[160,256], index: 1, kind: input, shape index: {}]   ;;  %s2189_s2 = inlined_call_operand.vmem [shape: f32[160,1], index: 2, kind: input, shape index: {}]   ;;  %s2190_s3 = inlined_call_operand.vmem [shape: f32[128,1], index: 3, kind: output, shape index: {}]  }
   0x1   :  { %10 = vsyncpa [#allocation3 + $0x1], 0 }
   0x2   :  { %11 = vsyncpa [#allocation5], 0 }
   0x3   :  { %13 = vsyncpa [#allocation5 + $0x1], 0  ;;  %s1422_s12 = smov 0   ;;  %s1424_s13 = smov 0  }
   0x4   :  { %s1426_s14 = smov 0   ;;  %s1428_s15 = smov 0  }
   0x5   :  { %s1430_s16 = smov 0   ;;  %s1432_s17 = smov 0  }
   0x6   :  { %s1434_s18 = smov 0   ;;  %s1436_s19 = smov 0  }
   0x7 LB: > { %s28_s20 = sadd.s32 1, %s1385_s17  ;;  %s31_s21 = sadd.s32 1, %s1389_s18  ;;  %s1393_s19 = sphi %s1436_s19, %s19_s19   ;;  %s1389_s18 = sphi %s1434_s18, %s2237_s18   ;;  %s1385_s17 = sphi %s1432_s17, %s2236_s17   ;;  %s1381_s16 = sphi %s1430_s16, %s2235_s16   ;;  %s1377_s15 = sphi %s1428_s15, %s2234_s15   ;;  %s1373_s14 = sphi %s1426_s14, %s2233_s14   ;;  %s1369_s13 = sphi %s1424_s13, %s2232_s13   ;;  %s1365_s12 = sphi %s1422_s12, %s2231_s12  }
   0x8   : > { %p29_p0 = scmp.ge.s32.totalorder %s28_s20, 2  ;;  %s1035_s22 = sadd.s32 4294967295, %s1393_s19  }
   0x9   : > { %s1037_s23 = sshll.u32 %s1389_s18, 1  ;;  %p53_p1 = scmp.ne.s32.totalorder %s1373_s14, %s1369_s13 }
   0xa   : > { %s2239_s20 = smov (%p29_p0, %s28_s20), 0  ;;  %s2241_s21 = smov (!%p29_p0, %s31_s21), %s1389_s18 }
   0xb   : > { %s36_s24 = sadd.s32 %s1385_s17, %s1037_s23  ;;  %p33_p2 = scmp.ge.s32.totalorder %s2241_s21, 2 }
   0xc   : > { %p37_p3 = scmp.lt.s32.totalorder %s36_s24, 2  ;;  %p54_p4 = scmp.eq.s32.totalorder %s1393_s19, 0 }
   0xd   : > { %p59_p5 = scmp.ne.s32.totalorder %s1369_s13, %s1365_s12  ;;  %s2243_s21 = smov (%p33_p2, %s2241_s21), 0 }
   0xe   : > { %s2245_s24 = smov (!%p37_p3, %s36_s24), 2  ;;  %s1038_s25 = sshll.u32 %s2243_s21, 1 }
   0xf   : > { %p1477_p6 = por %p54_p4, %p53_p1  ;;  %s40_s27 = sadd.s32 %s1038_s25, %s2239_s20 }
  0x10   : > { %p60_p7 = scmp.eq.s32.totalorder %s1035_s22, 0  ;;  %p41_p8 = scmp.lt.s32.totalorder %s40_s27, 2 }
  0x11   : > { %s46_s30 = sadd.s32 1, %s1373_s14  ;;  %p1044_p11 = scmp.ge.s32.totalorder %s1393_s19, 4 }
  0x12   : > { %p1482_p9 = por %p60_p7, %p59_p5  ;;  %s2247_s27 = smov (!%p41_p8, %s40_s27), 2 }
  0x13   : > { %s43_s29 = ssub.s32 %s2245_s24, %s2247_s27  ;;  %173 = sbr.rel (%p1044_p11) target bundleno = 96 (0x60), region = 16 }
  0x14   : > { %p44_p10 = scmp.eq.s32.totalorder %s43_s29, 0 }
  0x16   : > { %s1489_s4 = scalar_select %p44_p10, %s1373_s14, %s46_s30  }
  0x1a   : > { %176 = sbr.rel (!%p1477_p6) target bundleno = 61 (0x3d), region = 20  ;;  %s177_s5 = sand.u32 (%p1477_p6), 1, %s1373_s14  }
  0x1b   : > { %s1047_s6 = sshll.u32 (%p1477_p6), %s2245_s24, 3  ;;  %s1045_s7 = sshll.u32 (%p1477_p6), %s177_s5, 7 }
  0x1c   : > { %s187_s8 = ssub.s32 (%p1477_p6), 20, %s1047_s6  ;;  %s1499_s11 = scalar_lea.sflag (%p1477_p6), [#allocation3], %s177_s5 }
  0x1d   : > { %p188_p12 = scmp.lt.s32.totalorder (%p1477_p6), %s187_s8, 8  ;;  %s181_s12 = scalar_lea.vmem (%p1477_p6), [#allocation2], %s1045_s7 }
  0x21   : > { %s2249_s8 = smov (!%p188_p12, %s187_s8), 8 }
  0x22   : > { %s1496_s9 = sshll.u32 %s2249_s8, 8 }
  0x23   : > { %s193_s10 = ssub.s32 2048, %s1496_s9 }
  0x24   : > { %194 = vsyncadd %s1499_s11, %s193_s10  ;;  %p1050_p13 = scmp.ne.s32.totalorder %s1496_s9, 0  ;;  %s1080_s22 = sshll.u32 %s2245_s24, 11 }
  0x25   : > { %s1507_s27 = scalar_lea.hbm %s2187_s0, %s1080_s22  ;;  %s200_s29 = sshll.u32 %s181_s12, 4  ;;  %s1509_s29 = int_to_ptr.vmem [resolvable:$true] %s200_s29 }
  0x26   : > { %s1267_s30 = scalar_lea.hbm %s1507_s27, %s1496_s9  ;;  %s1271_s7 = scalar_lea.hbm %s2187_s0, 5120 }
  0x27   : > { %p1268_p0 = scmp.ne.s32.totalorder %s1507_s27, %s1267_s30  ;;  %p1272_p3 = scmp.lt.u32.totalorder %s1507_s27, %s2187_s0 }
  0x28   : > { %p1273_p4 = scmp.lt.u32.totalorder %s1271_s7, %s1267_s30  ;;  %p1275_p7 = scmp.lt.u32.totalorder %s1267_s30, %s1507_s27 }
  0x29   : > { %p1269_p1 = pnand %p1268_p0, %p1050_p13 }
  0x2a   : > { %p1274_p5 = por %p1273_p4, %p1272_p3 }
  0x2b   : > { %p1270_p2 = pneg %p1269_p1 }
  0x2c   : > { %p1276_p8 = por %p1275_p7, %p1274_p5 }
  0x2e   : > { %p1277_p10 = pnand %p1276_p8, %p1270_p2 }
  0x30   : > { %1280 = shalt.err (!%p1277_p10)
}
  0x31   : > { %s1281_s12 = scalar_lea.vmem %s1509_s29, %s1496_s9  ;;  %s1395_s22 = smov [#allocation2]  }
  0x32   : > { %p1282_p11 = scmp.ne.s32.totalorder %s1509_s29, %s1281_s12  ;;  %s1285_s23 = sshll.u32 %s1395_s22, 4  ;;  %s1286_s23 = int_to_ptr.vmem [resolvable:$false] %s1285_s23 }
  0x33   : > { %s1287_s25 = scalar_lea.vmem %s1286_s23, 4096  ;;  %p1288_p1 = scmp.lt.s32.totalorder %s1509_s29, %s1286_s23 }
  0x34   : > { %p1283_p12 = pnand %p1282_p11, %p1050_p13  ;;  %p1289_p3 = scmp.lt.s32.totalorder %s1287_s25, %s1281_s12 }
  0x36   : > { %p1284_p0 = pneg %p1283_p12  ;;  %p1290_p4 = por %p1289_p3, %p1288_p1 }
  0x38   : > { %p1291_p5 = pnand %p1290_p4, %p1284_p0 }
  0x3a   : > { %1294 = shalt.err (!%p1291_p5)
}
  0x3b   : > { %s1396_s30 = smov 256   ;;  %s1397_s5 = smov 16  }
  0x3c   : > { %206 = dma.hbm_to_vmem [thread:$0]  (%p1050_p13), %s1507_s27, %s1496_s9, %s1509_s29, %s1499_s11, %s1396_s30, %s1396_s30, %s1397_s5  }
  0x3d PF: > { %209 = sbr.rel (!%p1477_p6) target bundleno = 96 (0x60), region = 24  ;;  %s210_s6 = sand.u32 (%p1477_p6), 1, %s1373_s14  }
  0x3e   : > { %s1057_s7 = sshll.u32 (%p1477_p6), %s2245_s24, 3  ;;  %s1055_s8 = sshll.u32 (%p1477_p6), %s210_s6, 7 }
  0x3f   : > { %s220_s10 = ssub.s32 (%p1477_p6), 20, %s1057_s7  ;;  %s1543_s23 = scalar_lea.sflag (%p1477_p6), [#allocation5], %s210_s6 }
  0x40   : > { %p221_p2 = scmp.lt.s32.totalorder (%p1477_p6), %s220_s10, 8  ;;  %s214_s9 = scalar_lea.vmem (%p1477_p6), [#allocation4], %s1055_s8 }
  0x44   : > { %s2251_s10 = smov (!%p221_p2, %s220_s10), 8 }
  0x45   : > { %s1540_s12 = sshll.u32 %s2251_s10, 8 }
  0x46   : > { %s226_s22 = ssub.s32 2048, %s1540_s12 }
  0x47   : > { %227 = vsyncadd %s1543_s23, %s226_s22  ;;  %p1060_p6 = scmp.ne.s32.totalorder %s1540_s12, 0  ;;  %s1083_s26 = sshll.u32 %s2245_s24, 11 }
  0x48   : > { %s1551_s29 = scalar_lea.hbm %s2188_s1, %s1083_s26  ;;  %s233_s25 = sshll.u32 %s214_s9, 4  ;;  %s1553_s25 = int_to_ptr.vmem [resolvable:$true] %s233_s25 }
  0x49   : > { %s1295_s30 = scalar_lea.hbm %s1551_s29, %s1540_s12  ;;  %s1299_s24 = scalar_lea.hbm %s2188_s1, 5120 }
  0x4a   : > { %p1296_p13 = scmp.ne.s32.totalorder %s1551_s29, %s1295_s30  ;;  %p1300_p10 = scmp.lt.u32.totalorder %s1551_s29, %s2188_s1 }
  0x4b   : > { %p1301_p11 = scmp.lt.u32.totalorder %s1299_s24, %s1295_s30  ;;  %p1303_p0 = scmp.lt.u32.totalorder %s1295_s30, %s1551_s29 }
  0x4c   : > { %p1297_p7 = pnand %p1296_p13, %p1060_p6 }
  0x4d   : > { %p1302_p12 = por %p1301_p11, %p1300_p10 }
  0x4e   : > { %p1298_p8 = pneg %p1297_p7 }
  0x4f   : > { %p1304_p1 = por %p1303_p0, %p1302_p12 }
  0x51   : > { %p1305_p3 = pnand %p1304_p1, %p1298_p8 }
  0x53   : > { %1308 = shalt.err (!%p1305_p3)
}
  0x54   : > { %s1309_s10 = scalar_lea.vmem %s1553_s25, %s1540_s12  ;;  %s1398_s22 = smov [#allocation4]  }
  0x55   : > { %p1310_p4 = scmp.ne.s32.totalorder %s1553_s25, %s1309_s10  ;;  %s1313_s9 = sshll.u32 %s1398_s22, 4  ;;  %s1314_s9 = int_to_ptr.vmem [resolvable:$false] %s1313_s9 }
  0x56   : > { %s1315_s26 = scalar_lea.vmem %s1314_s9, 4096  ;;  %p1316_p13 = scmp.lt.s32.totalorder %s1553_s25, %s1314_s9 }
  0x57   : > { %p1311_p5 = pnand %p1310_p4, %p1060_p6  ;;  %p1317_p7 = scmp.lt.s32.totalorder %s1315_s26, %s1309_s10 }
  0x59   : > { %p1312_p2 = pneg %p1311_p5  ;;  %p1318_p10 = por %p1317_p7, %p1316_p13 }
  0x5b   : > { %p1319_p11 = pnand %p1318_p10, %p1312_p2 }
  0x5d   : > { %1322 = shalt.err (!%p1319_p11)
}
  0x5e   : > { %s1399_s11 = smov 256   ;;  %s1400_s27 = smov 16  }
  0x5f   : > { %239 = dma.hbm_to_vmem [thread:$0]  (%p1060_p6), %s1551_s29, %s1540_s12, %s1553_s25, %s1543_s23, %s1399_s11, %s1399_s11, %s1400_s27  }
  0x60 PF: > { %p1065_p8 = scmp.ge.s32.totalorder %s1393_s19, 1  ;;  %p266_p12 = scmp.lt.s32.totalorder %s1393_s19, 5 }
  0x62   : > { %p267_p0 = pnand %p1065_p8, %p266_p12 }
  0x64   : > { %270 = sbr.rel (%p267_p0) target bundleno = 470 (0x1d6), region = 32 }
  0x6b   : > { %s272_s30 = sand.u32 1, %s1369_s13  }
  0x6c   : > { %s1066_s5 = sshll.u32 %s272_s30, 7  ;;  %s273_s6 = scalar_lea.sflag [#allocation3], %s272_s30 }
  0x6d   : > { %s1583_s24 = scalar_lea.vmem [#allocation2], %s1066_s5 }
  0x6e   : > { %1356 = dma.done.wait (%p1482_p9), %s273_s6, 2048  }
  0x6f   : > { %1358 = vsyncadd (%p1482_p9), %s273_s6, 4294965248  ;;  %s282_s12 = scalar_lea.sflag [#allocation5], %s272_s30  ;;  %s1589_s23 = scalar_lea.vmem [#allocation4], %s1066_s5 }
  0x70   : > { %1360 = dma.done.wait (%p1482_p9), %s282_s12, 2048  }
  0x71   : > { %1362 = vsyncadd (%p1482_p9), %s282_s12, 4294965248  ;;  %s1068_s29 = sshll.u32 %s1381_s16, 1  ;;  %s1071_s25 = sshll.u32 %s1381_s16, 3 }
  0x72   : > { %s1598_s7 = sadd.s32 %s1377_s15, %s1068_s29  ;;  %p369_p6 = scmp.lt.s32.totalorder %s1071_s25, 15 }
  0x73   : > { %p348_p1 = scmp.lt.s32.totalorder %s1598_s7, 2  ;;  %p1073_p3 = scmp.ne.s32.totalorder %s1377_s15, 0 }
  0x74   : > { %s2253_s25 = smov (!%p369_p6, %s1071_s25), 15  ;;  %vm378_vm0 = vcmask (!%p1073_p3), 7168   ;;  %v1401_v0 = vmov (!%p1073_p3), 0.0  }
  0x75   : > { %s349_s8 = scalar_select %p348_p1, %s1598_s7, 2 }
  0x76   : > { %s1072_s10 = sshll.u32 %s2253_s25, 3  ;;  %377 = sbr.rel (%p1073_p3) target bundleno = 125 (0x7d), region = 44 }
  0x77   : > { %s1069_s22 = sshll.u32 %s349_s8, 3  ;;  %s1605_s28 = scalar_lea.vmem %s2190_s3, %s1072_s10 }
  0x78   : > { %p355_p9 = scmp.lt.s32.totalorder %s1069_s22, 19  ;;  %379 = vst.msk [vmem:[%s1605_s28] sm:$0xff] (!%p1073_p3), %vm378_vm0, %v1401_v0  ;;  %380 = vst.msk [vmem:[%s1605_s28 + $0x8] sm:$0xff] (!%p1073_p3), %vm378_vm0, %v1401_v0 }
  0x79   : > { %381 = vst.msk [vmem:[%s1605_s28 + $0x10] sm:$0xff] (!%p1073_p3), %vm378_vm0, %v1401_v0  ;;  %382 = vst.msk [vmem:[%s1605_s28 + $0x18] sm:$0xff] (!%p1073_p3), %vm378_vm0, %v1401_v0 }
  0x7a   : > { %s2255_s22 = smov (!%p355_p9, %s1069_s22), 19  ;;  %383 = vst.msk [vmem:[%s1605_s28 + $0x20] sm:$0xff] (!%p1073_p3), %vm378_vm0, %v1401_v0  ;;  %384 = vst.msk [vmem:[%s1605_s28 + $0x28] sm:$0xff] (!%p1073_p3), %vm378_vm0, %v1401_v0 }
  0x7b   : > { %s1070_s11 = sshll.u32 %s2255_s22, 3  ;;  %385 = vst.msk [vmem:[%s1605_s28 + $0x30] sm:$0xff] (!%p1073_p3), %vm378_vm0, %v1401_v0  ;;  %386 = vst.msk [vmem:[%s1605_s28 + $0x38] sm:$0xff] (!%p1073_p3), %vm378_vm0, %v1401_v0 }
  0x7c   : > { %s1610_s30 = scalar_lea.vmem %s2189_s2, %s1070_s11 }
  0x7d PF: > { %v1622_v1 = vld [vmem:[%s1583_s24] sm:$0xff]  ;;  %v1625_v2 = vld [vmem:[%s1583_s24 + $0x8] sm:$0xff]  ;;  %v1636_v6 = vld [vmem:[%s1583_s24 + $0x10] sm:$0xff]  ;;  %s1075_s15 = sshll.u32 %s1598_s7, 6 }
  0x7e   : > { %v1628_v3 = vld [vmem:[%s1583_s24 + $0x20] sm:$0xff]  ;;  %v427_v4 = vmax.f32 %v1622_v1, %v1625_v2  ;;  %v1633_v5 = vld [vmem:[%s1583_s24 + $0x28] sm:$0xff]  ;;  %v1641_v8 = vld [vmem:[%s1583_s24 + $0x18] sm:$0xff]  ;;  %v547_v25 = vand.u32 2147483647, %v1622_v1 }
  0x7f   : > { %v433_v7 = vmax.f32 %v1628_v3, %v1633_v5  ;;  %v1644_v9 = vld [vmem:[%s1583_s24 + $0x30] sm:$0xff]  ;;  %v430_v10 = vmax.f32 %v1636_v6, %v1641_v8  ;;  %v1649_v11 = vld [vmem:[%s1583_s24 + $0x38] sm:$0xff]  ;;  %v1654_v13 = vld [vmem:[%s1583_s24 + $0x40] sm:$0xff]  ;;  %v548_v26 = vand.u32 2147483647, %v1625_v2 }
  0x80   : > { %428 = vmax.xlane.f32.xlu0 %v427_v4  ;;  %v436_v12 = vmax.f32 %v1644_v9, %v1649_v11  ;;  %v1657_v14 = vld [vmem:[%s1583_s24 + $0x48] sm:$0xff]  ;;  %v1660_v15 = vld [vmem:[%s1583_s24 + $0x50] sm:$0xff]  ;;  %v1663_v16 = vld [vmem:[%s1583_s24 + $0x58] sm:$0xff]  ;;  %v549_v27 = vand.u32 2147483647, %v1636_v6  ;;  %v563_v29 = vsub.f32 0.0, %v547_v25 }
  0x81   : > { %434 = vmax.xlane.f32.xlu1 %v433_v7  ;;  %v439_v17 = vmax.f32 %v1654_v13, %v1657_v14  ;;  %v442_v18 = vmax.f32 %v1660_v15, %v1663_v16  ;;  %v1670_v19 = vld [vmem:[%s1583_s24 + $0x60] sm:$0xff]  ;;  %v1673_v20 = vld [vmem:[%s1583_s24 + $0x68] sm:$0xff]  ;;  %v1676_v21 = vld [vmem:[%s1583_s24 + $0x70] sm:$0xff]  ;;  %v550_v28 = vand.u32 2147483647, %v1641_v8  ;;  %v564_v30 = vsub.f32 0.0, %v548_v26 }
  0x82   : > { %v1679_v22 = vld [vmem:[%s1583_s24 + $0x78] sm:$0xff]  ;;  %v445_v23 = vmax.f32 %v1670_v19, %v1673_v20  ;;  %v565_v31 = vsub.f32 0.0, %v549_v27  ;;  %v579_v33 = vmul.f32 1.442695, %v563_v29  ;;  %v551_v34 = vand.u32 2147483647, %v1628_v3 }
  0x83   : > { %v448_v24 = vmax.f32 %v1676_v21, %v1679_v22  ;;  %v566_v32 = vsub.f32 0.0, %v550_v28  ;;  %v581_v35 = vmul.f32 1.442695, %v564_v30  ;;  %v552_v37 = vand.u32 2147483647, %v1633_v5 }
  0x84   : > { %431 = vmax.xlane.f32.xlu0 %v430_v10  ;;  %v583_v36 = vmul.f32 1.442695, %v565_v31  ;;  %1155 = vpow2.f32 %v579_v33  ;;  %v567_v39 = vsub.f32 0.0, %v551_v34  ;;  %v553_v40 = vand.u32 2147483647, %v1644_v9 }
  0x85   : > { %437 = vmax.xlane.f32.xlu1 %v436_v12  ;;  %v585_v38 = vmul.f32 1.442695, %v566_v32  ;;  %1157 = vpow2.f32 %v581_v35  ;;  %v554_v41 = vand.u32 2147483647, %v1649_v11  ;;  %v555_v42 = vand.u32 2147483647, %v1654_v13 }
  0x86   : > { %1159 = vpow2.f32 %v583_v36  ;;  %v568_v43 = vsub.f32 0.0, %v552_v37  ;;  %v556_v44 = vand.u32 2147483647, %v1657_v14  ;;  %v587_v45 = vmul.f32 1.442695, %v567_v39  ;;  %v403_v39 = vld [vmem:[%s1589_s23] sm:$0xff] }
  0x87   : > { %1161 = vpow2.f32 %v585_v38  ;;  %v569_v46 = vsub.f32 0.0, %v553_v40  ;;  %v557_v47 = vand.u32 2147483647, %v1660_v15  ;;  %v570_v48 = vsub.f32 0.0, %v554_v41 }
  0x88   : > { %440 = vmax.xlane.f32.xlu0 %v439_v17  ;;  %v571_v49 = vsub.f32 0.0, %v555_v42  ;;  %v589_v50 = vmul.f32 1.442695, %v568_v43  ;;  %v572_v51 = vsub.f32 0.0, %v556_v44  ;;  %1163 = vpow2.f32 %v587_v45  ;;  %v404_v42 = vld [vmem:[%s1589_s23 + $0x8] sm:$0xff] }
  0x89   : > { %443 = vmax.xlane.f32.xlu1 %v442_v18  ;;  %v591_v52 = vmul.f32 1.442695, %v569_v46  ;;  %v573_v53 = vsub.f32 0.0, %v557_v47  ;;  %v593_v54 = vmul.f32 1.442695, %v570_v48  ;;  %v499_v47 = vmax.f32 %v1622_v1, 0.0 }
  0x8a   : > { %v558_v55 = vand.u32 2147483647, %v1663_v16  ;;  %v595_v57 = vmul.f32 1.442695, %v571_v49  ;;  %v559_v58 = vand.u32 2147483647, %v1670_v19  ;;  %1165 = vpow2.f32 %v589_v50 }
  0x8b   : > { %v597_v60 = vmul.f32 1.442695, %v572_v51  ;;  %v560_v61 = vand.u32 2147483647, %v1673_v20  ;;  %1167 = vpow2.f32 %v591_v52  ;;  %v599_v63 = vmul.f32 1.442695, %v573_v53 }
  0x8c   : > { %446 = vmax.xlane.f32.xlu0 %v445_v23  ;;  %v561_v0 = vand.u32 2147483647, %v1676_v21  ;;  %1169 = vpow2.f32 %v593_v54  ;;  %v574_v7 = vsub.f32 0.0, %v558_v55  ;;  %v575_v12 = vsub.f32 0.0, %v559_v58  ;;  %v405_v58 = vld [vmem:[%s1589_s23 + $0x10] sm:$0xff] }
  0x8d   : > { %449 = vmax.xlane.f32.xlu1 %v448_v24  ;;  %1171 = vpow2.f32 %v595_v57  ;;  %v562_v17 = vand.u32 2147483647, %v1679_v22  ;;  %v576_v23 = vsub.f32 0.0, %v560_v61  ;;  %v515_v48 = vmul.f32 %v403_v39, %v1622_v1 }
  0x8e   : > { %v1697_v56 = vpop.eup %1155  ;;  %1173 = vpow2.f32 %v597_v60  ;;  %v577_v25 = vsub.f32 0.0, %v561_v0  ;;  %v601_v27 = vmul.f32 1.442695, %v574_v7  ;;  %v603_v29 = vmul.f32 1.442695, %v575_v12  ;;  %v406_v7 = vld [vmem:[%s1589_s23 + $0x18] sm:$0xff] }
  0x8f   : > { %v1700_v59 = vpop.eup %1157  ;;  %v611_v10 = vadd.f32 1.0, %v1697_v56  ;;  %1175 = vpow2.f32 %v599_v63  ;;  %v578_v30 = vsub.f32 0.0, %v562_v17  ;;  %v605_v31 = vmul.f32 1.442695, %v576_v23 }
  0x90   : > { %v1703_v62 = vpop.eup %1159  ;;  %v620_v18 = vadd.f32 1.0, %v1700_v59  ;;  %v607_v32 = vmul.f32 1.442695, %v577_v25  ;;  %v614_v33 = vmul.f32 -0.5, %v1697_v56  ;;  %v623_v35 = vmul.f32 -0.5, %v1700_v59 }
  0x91   : > { %v1706_v4 = vpop.eup %1161  ;;  %v629_v24 = vadd.f32 1.0, %v1703_v62  ;;  %1177 = vlog2.f32 %v611_v10  ;;  %v609_v38 = vmul.f32 1.442695, %v578_v30  ;;  %v632_v44 = vmul.f32 -0.5, %v1703_v62 }
  0x92   : > { %v638_v26 = vadd.f32 1.0, %v1706_v4  ;;  %v1713_v28 = vpop.eup %1163  ;;  %1179 = vlog2.f32 %v620_v18  ;;  %v615_v43 = vadd.f32 1.0, %v614_v33  ;;  %v641_v45 = vmul.f32 -0.5, %v1706_v4  ;;  %v410_v33 = vld [vmem:[%s1589_s23 + $0x38] sm:$0xff] }
  0x93   : > { %1181 = vlog2.f32 %v629_v24  ;;  %v647_v36 = vadd.f32 1.0, %v1713_v28  ;;  %v624_v49 = vadd.f32 1.0, %v623_v35  ;;  %v500_v54 = vmax.f32 %v1625_v2, 0.0 }
  0x94   : > { %1183 = vlog2.f32 %v638_v26  ;;  %v1716_v34 = vpop.eup %1165  ;;  %v516_v55 = vmul.f32 %v404_v42, %v1625_v2  ;;  %v617_v57 = vand.u32 2147483647, %v1697_v56  ;;  %v616_v63 = vmul.f32 %v1697_v56, %v615_v43 }
  0x95   : > { %1185 = vpow2.f32 %v601_v27  ;;  %v1720_v37 = vpop.eup %1167  ;;  %v656_v51 = vadd.f32 1.0, %v1716_v34  ;;  %v626_v0 = vand.u32 2147483647, %v1700_v59  ;;  %v633_v10 = vadd.f32 1.0, %v632_v44  ;;  %v407_v44 = vld [vmem:[%s1589_s23 + $0x20] sm:$0xff] }
  0x96   : > { %1187 = vpow2.f32 %v603_v29  ;;  %v1723_v40 = vpop.eup %1169  ;;  %v1738_v52 = vadd.f32 1.0, %v1720_v37  ;;  %v642_v12 = vadd.f32 1.0, %v641_v45  ;;  %v531_v18 = vsub.f32 %v499_v47, %v515_v48 }
  0x97   : > { %1189 = vpow2.f32 %v605_v31  ;;  %v1725_v41 = vpop.eup %1171  ;;  %v1745_v60 = vadd.f32 1.0, %v1723_v40  ;;  %v625_v23 = vmul.f32 %v1700_v59, %v624_v49  ;;  %v501_v24 = vmax.f32 %v1636_v6, 0.0  ;;  %v408_v49 = vld [vmem:[%s1589_s23 + $0x28] sm:$0xff] }
  0x98   : > { %1191 = vpow2.f32 %v607_v32  ;;  %v1730_v46 = vpop.eup %1173  ;;  %v650_v25 = vmul.f32 -0.5, %v1713_v28  ;;  %v517_v29 = vmul.f32 %v405_v58, %v1636_v6  ;;  %v635_v56 = vand.u32 2147483647, %v1703_v62 }
  0x99   : > { %1193 = vlog2.f32 %v647_v36  ;;  %v1734_v50 = vpop.eup %1175  ;;  %v644_v30 = vand.u32 2147483647, %v1706_v4  ;;  %v532_v32 = vsub.f32 %v500_v54, %v516_v55  ;;  %vm1758_vm1 = vcmp.lt.f32.partialorder %v617_v57, 0.0004427343 }
  0x9a   : > { %1195 = vpow2.f32 %v609_v38  ;;  %v502_v59 = vmax.f32 %v1641_v8, 0.0  ;;  %v518_v35 = vmul.f32 %v406_v7, %v1641_v8  ;;  %vm1766_vm2 = vcmp.lt.f32.partialorder %v626_v0, 0.0004427343 }
  0x9b   : > { %v1178_v53 = vpop.eup %1177  ;;  %v634_v42 = vmul.f32 %v1703_v62, %v633_v10  ;;  %v643_v43 = vmul.f32 %v1706_v4, %v642_v12  ;;  %1197 = vlog2.f32 %v656_v51  ;;  %v533_v57 = vsub.f32 %v501_v24, %v517_v29  ;;  %v409_v10 = vld [vmem:[%s1589_s23 + $0x30] sm:$0xff] }
  0x9c   : > { %v1180_v61 = vpop.eup %1179  ;;  %v613_v27 = vmul.f32 0.6931472, %v1178_v53  ;;  %v651_v53 = vadd.f32 1.0, %v650_v25  ;;  %vm1780_vm3 = vcmp.lt.f32.partialorder %v635_v56, 0.0004427343  ;;  %v503_v0 = vmax.f32 %v1628_v3, 0.0 }
  0x9d   : > { %v1182_v17 = vpop.eup %1181  ;;  %v622_v38 = vmul.f32 0.6931472, %v1180_v61  ;;  %vm1784_vm4 = vcmp.lt.f32.partialorder %v644_v30, 0.0004427343  ;;  %v534_v61 = vsub.f32 %v502_v59, %v518_v35  ;;  %v519_v51 = vmul.f32 %v407_v44, %v1628_v3 }
  0x9e   : > { %v1184_v26 = vpop.eup %1183  ;;  %v631_v47 = vmul.f32 0.6931472, %v1182_v17  ;;  %v619_v55 = vsel %vm1758_vm1, %v616_v63, %v613_v27  ;;  %v653_v7 = vand.u32 2147483647, %v1713_v28  ;;  %v504_v17 = vmax.f32 %v1633_v5, 0.0 }
  0x9f   : > { %v1756_v31 = vpop.eup %1185  ;;  %v640_v48 = vmul.f32 0.6931472, %v1184_v26  ;;  %v628_v12 = vsel %vm1766_vm2, %v625_v23, %v622_v38  ;;  %v520_v24 = vmul.f32 %v408_v49, %v1633_v5  ;;  %v659_v25 = vmul.f32 -0.5, %v1716_v34 }
  0xa0   : > { %v1764_v36 = vpop.eup %1187  ;;  %v1799_v26 = vadd.f32 %v619_v55, %v531_v18  ;;  %v637_v27 = vsel %vm1780_vm3, %v634_v42, %v631_v47  ;;  %v652_v56 = vmul.f32 %v1713_v28, %v651_v53  ;;  %v662_v23 = vand.u32 2147483647, %v1716_v34  ;;  %v412_v55 = vld [vmem:[%s1589_s23 + $0x48] sm:$0xff] }
  0xa1   : > { %v1773_v45 = vpop.eup %1189  ;;  %v646_v29 = vsel %vm1784_vm4, %v643_v43, %v640_v48  ;;  %v505_v59 = vmax.f32 %v1644_v9, 0.0  ;;  %v521_v35 = vmul.f32 %v409_v10, %v1644_v9  ;;  %v1810_v18 = vadd.f32 %v628_v12, %v532_v32  ;;  %v411_v48 = vld [vmem:[%s1589_s23 + $0x40] sm:$0xff] }
  0xa2   : > { %v1776_v54 = vpop.eup %1191  ;;  %v535_v38 = vsub.f32 %v503_v0, %v519_v51  ;;  %vm1812_vm5 = vcmp.lt.f32.partialorder %v653_v7, 0.0004427343  ;;  %v668_v42 = vmul.f32 -0.5, %v1720_v37  ;;  %v1817_v43 = vadd.f32 %v637_v27, %v533_v57 }
  0xa3   : > { %v1194_v4 = vpop.eup %1193  ;;  %v1819_v28 = vadd.f32 %v646_v29, %v534_v61  ;;  %v536_v44 = vsub.f32 %v504_v17, %v520_v24  ;;  %v660_v47 = vadd.f32 1.0, %v659_v25  ;;  %v506_v49 = vmax.f32 %v1649_v11, 0.0 }
  0xa4   : > { %v1792_v63 = vpop.eup %1195  ;;  %v649_v30 = vmul.f32 0.6931472, %v1194_v4  ;;  %v522_v53 = vmul.f32 %v410_v33, %v1649_v11  ;;  %1199 = vlog2.f32 %v1738_v52  ;;  %v677_v32 = vmul.f32 -0.5, %v1723_v40 }
  0xa5   : > { %vm1829_vm6 = vcmp.lt.f32.partialorder %v662_v23, 0.0004427343  ;;  %v1833_v62 = vsub.f32 %v505_v59, %v521_v35  ;;  %v671_v4 = vand.u32 2147483647, %v1720_v37  ;;  %v1198_v61 = vpop.eup %1197  ;;  %v669_v0 = vadd.f32 1.0, %v668_v42 }
  0xa6   : > { %v655_v58 = vsel %vm1812_vm5, %v652_v56, %v649_v30  ;;  %v507_v51 = vmax.f32 %v1654_v13, 0.0  ;;  %v523_v52 = vmul.f32 %v411_v48, %v1654_v13  ;;  %v686_v7 = vmul.f32 -0.5, %v1725_v41 }
  0xa7   : > { %v661_v10 = vmul.f32 %v1716_v34, %v660_v47  ;;  %v508_v12 = vmax.f32 %v1657_v14, 0.0  ;;  %v524_v17 = vmul.f32 %v412_v55, %v1657_v14  ;;  %v683_v24 = vadd.f32 1.0, %v1725_v41 }
  0xa8   : > { %v1843_v25 = vadd.f32 %v655_v58, %v535_v38  ;;  %v1845_v27 = vsub.f32 %v506_v49, %v522_v53  ;;  %v678_v29 = vadd.f32 1.0, %v677_v32  ;;  %v692_v56 = vadd.f32 1.0, %v1730_v46  ;;  %v414_v49 = vld [vmem:[%s1589_s23 + $0x58] sm:$0xff] }
  0xa9   : > { %v658_v30 = vmul.f32 0.6931472, %v1198_v61  ;;  %1201 = vlog2.f32 %v1745_v60  ;;  %v680_v34 = vand.u32 2147483647, %v1723_v40  ;;  %v695_v23 = vmul.f32 -0.5, %v1730_v46 }
  0xaa   : > { %v1852_v33 = vmul.f32 %v1720_v37, %v669_v0  ;;  %v1854_v59 = vsub.f32 %v507_v51, %v523_v52  ;;  %v687_v35 = vadd.f32 1.0, %v686_v7  ;;  %v701_v38 = vadd.f32 1.0, %v1734_v50  ;;  %v413_v37 = vld [vmem:[%s1589_s23 + $0x50] sm:$0xff] }
  0xab   : > { %vm1857_vm7 = vcmp.lt.f32.partialorder %v671_v4, 0.0004427343  ;;  %v1861_v42 = vsub.f32 %v508_v12, %v524_v17  ;;  %1203 = vlog2.f32 %v683_v24  ;;  %v689_v60 = vand.u32 2147483647, %v1725_v41 }
  0xac   : > { %v710_v47 = vadd.f32 1.0, %v1756_v31  ;;  %v1866_v48 = vmul.f32 %v1723_v40, %v678_v29  ;;  %1205 = vlog2.f32 %v692_v56  ;;  %v509_v53 = vmax.f32 %v1660_v15, 0.0 }
  0xad   : > { %v719_v32 = vadd.f32 1.0, %v1764_v36  ;;  %v664_v55 = vsel %vm1829_vm6, %v661_v10, %v658_v30  ;;  %v696_v58 = vadd.f32 1.0, %v695_v23  ;;  %v698_v4 = vand.u32 2147483647, %v1730_v46 }
  0xae   : > { %v728_v61 = vadd.f32 1.0, %v1773_v45  ;;  %v1200_v0 = vpop.eup %1199  ;;  %v1877_v51 = vmul.f32 %v1725_v41, %v687_v35  ;;  %v510_v40 = vmax.f32 %v1663_v16, 0.0  ;;  %1207 = vlog2.f32 %v701_v38 }
  0xaf   : > { %v737_v52 = vadd.f32 1.0, %v1776_v54  ;;  %v525_v12 = vmul.f32 %v413_v37, %v1660_v15  ;;  %v526_v57 = vmul.f32 %v414_v49, %v1663_v16  ;;  %1209 = vlog2.f32 %v710_v47 }
  0xb0   : > { %v746_v10 = vadd.f32 1.0, %v1792_v63  ;;  %v1886_v56 = vadd.f32 %v664_v55, %v536_v44  ;;  %1211 = vlog2.f32 %v719_v32  ;;  %v667_v35 = vmul.f32 0.6931472, %v1200_v0 }
  0xb1   : > { %vm1890_vm8 = vcmp.lt.f32.partialorder %v680_v34, 0.0004427343  ;;  %1213 = vlog2.f32 %v728_v61  ;;  %v1897_v55 = vsub.f32 %v509_v53, %v525_v12  ;;  %v1901_v61 = vsub.f32 %v510_v40, %v526_v57 }
  0xb2   : > { %1215 = vlog2.f32 %v737_v52  ;;  %vm1919_vm9 = vcmp.lt.f32.partialorder %v689_v60, 0.0004427343  ;;  %vm1935_vm10 = vcmp.lt.f32.partialorder %v698_v4, 0.0004427343  ;;  %vm912_vm2 = vcmask 7168  }
  0xb3   : > { %1217 = vlog2.f32 %v746_v10 }
 0x10d   : > { %v429_v7 = vpop.xlane.xlu0 %428 }
 0x10e   : > { %v451_v17 = vsub.f32 %v1622_v1, %v429_v7  ;;  %v452_v24 = vsub.f32 %v1625_v2, %v429_v7  ;;  %v435_v29 = vpop.xlane.xlu1 %434  ;;  %v1895_v1 = vmul.f32 %v1730_v46, %v696_v58  ;;  %v1202_v2 = vpop.eup %1201  ;;  %v704_v7 = vmul.f32 -0.5, %v1734_v50 }
 0x10f   : > { %v455_v30 = vsub.f32 %v1628_v3, %v435_v29  ;;  %v456_v23 = vsub.f32 %v1633_v5, %v435_v29  ;;  %v1204_v0 = vpop.eup %1203  ;;  %v1911_v10 = vmul.f32 0.6931472, %v1202_v2 }
 0x110   : > { %v467_v47 = vmul.f32 1.442695, %v451_v17  ;;  %v469_v37 = vmul.f32 1.442695, %v452_v24  ;;  %v1906_v17 = vpop.eup %1205 }
 0x111   : > { %v475_v44 = vmul.f32 1.442695, %v455_v30  ;;  %v477_v49 = vmul.f32 1.442695, %v456_v23  ;;  %v432_v32 = vpop.xlane.xlu0 %431 }
 0x112   : > { %1219 = vpow2.f32 %v467_v47  ;;  %v453_v3 = vsub.f32 %v1636_v6, %v432_v32  ;;  %v454_v5 = vsub.f32 %v1641_v8, %v432_v32  ;;  %v438_v34 = vpop.xlane.xlu1 %437  ;;  %v673_v6 = vsel %vm1857_vm7, %v1852_v33, %v667_v35 }
 0x113   : > { %1221 = vpow2.f32 %v469_v37  ;;  %v457_v58 = vsub.f32 %v1644_v9, %v438_v34  ;;  %v458_v52 = vsub.f32 %v1649_v11, %v438_v34  ;;  %v1913_v9 = vpop.eup %1207  ;;  %v707_v33 = vand.u32 2147483647, %v1734_v50 }
 0x114   : > { %1223 = vpow2.f32 %v475_v44  ;;  %v471_v53 = vmul.f32 1.442695, %v453_v3  ;;  %v473_v12 = vmul.f32 1.442695, %v454_v5  ;;  %v1924_v39 = vpop.eup %1209  ;;  %v705_v37 = vadd.f32 1.0, %v704_v7  ;;  %v415_v7 = vld [vmem:[%s1589_s23 + $0x60] sm:$0xff] }
 0x115   : > { %1225 = vpow2.f32 %v477_v49  ;;  %v479_v8 = vmul.f32 1.442695, %v457_v58  ;;  %v481_v40 = vmul.f32 1.442695, %v458_v52  ;;  %v441_v57 = vpop.xlane.xlu0 %440  ;;  %v713_v44 = vmul.f32 -0.5, %v1756_v31 }
 0x116   : > { %1227 = vpow2.f32 %v471_v53  ;;  %v459_v11 = vsub.f32 %v1654_v13, %v441_v57  ;;  %v460_v24 = vsub.f32 %v1657_v14, %v441_v57  ;;  %v444_v29 = vpop.xlane.xlu1 %443  ;;  %v1929_v13 = vadd.f32 %v673_v6, %v1833_v62  ;;  %v1931_v14 = vpop.eup %1211  ;;  %v416_v57 = vld [vmem:[%s1589_s23 + $0x68] sm:$0xff] }
 0x117   : > { %1229 = vpow2.f32 %v473_v12  ;;  %v461_v23 = vsub.f32 %v1660_v15, %v444_v29  ;;  %v462_v35 = vsub.f32 %v1663_v16, %v444_v29  ;;  %v1939_v2 = vpop.eup %1213  ;;  %v682_v3 = vsel %vm1890_vm8, %v1866_v48, %v1911_v10 }
 0x118   : > { %1231 = vpow2.f32 %v479_v8  ;;  %v483_v41 = vmul.f32 1.442695, %v459_v11  ;;  %v485_v60 = vmul.f32 1.442695, %v460_v24  ;;  %v1942_v49 = vpop.eup %1215  ;;  %v716_v52 = vand.u32 2147483647, %v1756_v31 }
 0x119   : > { %1233 = vpow2.f32 %v481_v40  ;;  %v487_v15 = vmul.f32 1.442695, %v461_v23  ;;  %v489_v16 = vmul.f32 1.442695, %v462_v35  ;;  %v447_v62 = vpop.xlane.xlu0 %446  ;;  %v1950_v5 = vpop.eup %1217  ;;  %v685_v8 = vmul.f32 0.6931472, %v1204_v0 }
 0x11a   : > { %1235 = vpow2.f32 %v483_v41  ;;  %v463_v32 = vsub.f32 %v1670_v19, %v447_v62  ;;  %v464_v46 = vsub.f32 %v1673_v20, %v447_v62  ;;  %v450_v4 = vpop.xlane.xlu1 %449  ;;  %v722_v10 = vmul.f32 -0.5, %v1764_v36 }
 0x11b   : > { %1237 = vpow2.f32 %v485_v60  ;;  %v465_v34 = vsub.f32 %v1676_v21, %v450_v4  ;;  %v466_v58 = vsub.f32 %v1679_v22, %v450_v4  ;;  %v714_v29 = vadd.f32 1.0, %v713_v44 }
 0x11c   : > { %v1956_v53 = vpop.eup %1219  ;;  %1239 = vpow2.f32 %v487_v15  ;;  %v491_v12 = vmul.f32 1.442695, %v463_v32  ;;  %v493_v6 = vmul.f32 1.442695, %v464_v46  ;;  %v511_v23 = vmax.f32 %v1670_v19, 0.0 }
 0x11d   : > { %v1958_v40 = vpop.eup %1221  ;;  %1241 = vpow2.f32 %v489_v16  ;;  %v495_v48 = vmul.f32 1.442695, %v465_v34  ;;  %v497_v38 = vmul.f32 1.442695, %v466_v58  ;;  %v694_v0 = vmul.f32 0.6931472, %v1906_v17 }
 0x11e   : > { %v1962_v11 = vpop.eup %1223  ;;  %1243 = vpow2.f32 %v491_v12  ;;  %v811_v24 = vadd.f32 %v1958_v40, %v1956_v53  ;;  %v512_v41 = vmax.f32 %v1673_v20, 0.0  ;;  %v527_v60 = vmul.f32 %v415_v7, %v1670_v19 }
 0x11f   : > { %v1967_v35 = vpop.eup %1225  ;;  %1245 = vpow2.f32 %v493_v6  ;;  %vm1976_vm11 = vcmp.lt.f32.partialorder %v707_v33, 0.0004427343  ;;  %v528_v44 = vmul.f32 %v416_v57, %v1673_v20  ;;  %v725_v32 = vand.u32 2147483647, %v1764_v36 }
 0x120   : > { %v1972_v15 = vpop.eup %1227  ;;  %1247 = vpow2.f32 %v495_v48  ;;  %812 = vadd.xlane.f32.xlu0 %v811_v24  ;;  %v817_v16 = vadd.f32 %v1967_v35, %v1962_v11  ;;  %v691_v19 = vsel %vm1919_vm9, %v1877_v51, %v685_v8  ;;  %v723_v46 = vadd.f32 1.0, %v722_v10 }
 0x121   : > { %v1982_v17 = vpop.eup %1229  ;;  %1249 = vpow2.f32 %v497_v38  ;;  %v731_v4 = vmul.f32 -0.5, %v1773_v45  ;;  %v1993_v58 = vadd.f32 %v682_v3, %v1845_v27  ;;  %v1996_v20 = vmul.f32 %v1734_v50, %v705_v37 }
 0x122   : > { %v1988_v34 = vpop.eup %1231  ;;  %v814_v33 = vadd.f32 %v1982_v17, %v1972_v15  ;;  %vm1998_vm12 = vcmp.lt.f32.partialorder %v716_v52, 0.0004427343  ;;  %v700_v51 = vsel %vm1935_vm10, %v1895_v1, %v694_v0  ;;  %v2008_v12 = vmul.f32 %v1756_v31, %v714_v29  ;;  %v417_v29 = vld [vmem:[%s1589_s23 + $0x70] sm:$0xff] }
 0x123   : > { %v2002_v30 = vpop.eup %1233  ;;  %v2010_v6 = vsub.f32 %v511_v23, %v527_v60  ;;  %v740_v27 = vmul.f32 -0.5, %v1776_v54  ;;  %v2018_v37 = vadd.f32 %v691_v19, %v1854_v59  ;;  %v544_v1 = vsub.f32 %v512_v41, %v528_v44  ;;  %v418_v23 = vld [vmem:[%s1589_s23 + $0x78] sm:$0xff] }
 0x124   : > { %v2013_v3 = vpop.eup %1235  ;;  %818 = vadd.xlane.f32.xlu0 %v817_v16  ;;  %815 = vadd.xlane.f32.xlu1 %v814_v33  ;;  %v820_v50 = vadd.f32 %v2002_v30, %v1988_v34  ;;  %v749_v31 = vmul.f32 -0.5, %v1792_v63  ;;  %v724_v52 = vmul.f32 %v1764_v36, %v723_v46  ;;  %vm2024_vm13 = vcmp.lt.f32.partialorder %v725_v32, 0.0004427343 }
 0x125   : > { %v2021_v47 = vpop.eup %1237  ;;  %v732_v48 = vadd.f32 1.0, %v731_v4  ;;  %v734_v38 = vand.u32 2147483647, %v1773_v45  ;;  %v764_v10 = vadd.f32 %v700_v51, %v1861_v42  ;;  %v703_v24 = vmul.f32 0.6931472, %v1913_v9 }
 0x126   : > { %v2029_v57 = vpop.eup %1239  ;;  %v823_v59 = vadd.f32 %v2021_v47, %v2013_v3  ;;  %v513_v36 = vmax.f32 %v1676_v21, 0.0  ;;  %v712_v41 = vmul.f32 0.6931472, %v1924_v39  ;;  %v514_v60 = vmax.f32 %v1679_v22, 0.0 }
 0x127   : > { %2221 = vst [vmem:[#allocation8_spill] sm:$0xff] %v2029_v57  ;;  %v2038_v0 = vpop.eup %1241  ;;  %v741_v16 = vadd.f32 1.0, %v740_v27  ;;  %v743_v44 = vand.u32 2147483647, %v1776_v54  ;;  %v721_v9 = vmul.f32 0.6931472, %v1931_v14  ;;  %v733_v39 = vmul.f32 %v1773_v45, %v732_v48 }
 0x128   : > { %2222 = vst [vmem:[#allocation9_spill] sm:$0xff] %v2038_v0  ;;  %v1244_v32 = vpop.eup %1243  ;;  %821 = vadd.xlane.f32.xlu1 %v820_v50  ;;  %824 = vadd.xlane.f32.xlu0 %v823_v59  ;;  %v826_v42 = vadd.f32 %v2038_v0, %v2029_v57  ;;  %v750_v19 = vadd.f32 1.0, %v749_v31  ;;  %v752_v46 = vand.u32 2147483647, %v1792_v63  ;;  %v730_v33 = vmul.f32 0.6931472, %v1939_v2 }
 0x129   : > { %v1246_v4 = vpop.eup %1245  ;;  %vm2049_vm14 = vcmp.lt.f32.partialorder %v734_v38, 0.0004427343  ;;  %v529_v27 = vmul.f32 %v417_v29, %v1676_v21  ;;  %v771_v0 = vmul.f32 %v1956_v53, %v1799_v26  ;;  %v772_v14 = vmul.f32 %v1958_v40, %v1810_v18  ;;  %v420_v53 = vld [vmem:[%s1610_s30 + $0x8] sm:$0xff] }
 0x12a   : > { %v1248_v50 = vpop.eup %1247  ;;  %v829_v59 = vadd.f32 %v1246_v4, %v1244_v32  ;;  %v530_v31 = vmul.f32 %v418_v23, %v1679_v22  ;;  %v709_v45 = vsel %vm1976_vm11, %v1996_v20, %v703_v24  ;;  %v718_v2 = vsel %vm1998_vm12, %v2008_v12, %v712_v41 }
 0x12b   : > { %v1250_v57 = vpop.eup %1249  ;;  %v742_v21 = vmul.f32 %v1776_v54, %v741_v16  ;;  %vm2066_vm15 = vcmp.lt.f32.partialorder %v743_v44, 0.0004427343  ;;  %v727_v22 = vsel %vm2024_vm13, %v724_v52, %v721_v9  ;;  %v751_v18 = vmul.f32 %v1792_v63, %v750_v19 }
 0x12c   : > { %827 = vadd.xlane.f32.xlu1 %v826_v42  ;;  %830 = vadd.xlane.f32.xlu0 %v829_v59  ;;  %v832_v26 = vadd.f32 %v1250_v57, %v1248_v50  ;;  %vm2073_vm0 = vcmp.lt.f32.partialorder %v752_v46, 0.0004427343  ;;  %v775_v40 = vmul.f32 %v1962_v11, %v1843_v25  ;;  %v736_v54 = vsel %vm2049_vm14, %v733_v39, %v730_v33 }
 0x12d   : > { %v739_v62 = vmul.f32 0.6931472, %v1942_v49  ;;  %v748_v20 = vmul.f32 0.6931472, %v1950_v5  ;;  %v787_v7 = vadd.f32 %v772_v14, %v771_v0  ;;  %v773_v12 = vmul.f32 %v1972_v15, %v1817_v43 }
 0x12e   : > { %v774_v63 = vmul.f32 %v1982_v17, %v1819_v28  ;;  %v776_v52 = vmul.f32 %v1967_v35, %v1886_v56  ;;  %v765_v8 = vadd.f32 %v709_v45, %v1897_v55  ;;  %v545_v25 = vsub.f32 %v513_v36, %v529_v27 }
 0x12f   : > { %v546_v11 = vsub.f32 %v514_v60, %v530_v31  ;;  %v766_v49 = vadd.f32 %v718_v2, %v1901_v61  ;;  %v767_v5 = vadd.f32 %v727_v22, %v2010_v6  ;;  %v768_v38 = vadd.f32 %v736_v54, %v544_v1  ;;  %v2230_v24 = vld [vmem:[#allocation9_spill] sm:$0xff]  ;;  %v421_v54 = vld [vmem:[%s1610_s30 + $0x10] sm:$0xff] }
 0x130   : > { %833 = vadd.xlane.f32.xlu1 %v832_v26  ;;  %788 = vadd.xlane.f32.xlu0 %v787_v7  ;;  %v777_v43 = vmul.f32 %v1988_v34, %v1929_v13  ;;  %v778_v28 = vmul.f32 %v2002_v30, %v1993_v58  ;;  %v745_v56 = vsel %vm2066_vm15, %v742_v21, %v739_v62  ;;  %v2229_v13 = vld [vmem:[#allocation8_spill] sm:$0xff]  ;;  %v854_v44 = vlaneseq }
 0x131   : > { %v754_v55 = vsel %vm2073_vm0, %v751_v18, %v748_v20  ;;  %v790_v35 = vadd.f32 %v774_v63, %v773_v12  ;;  %v793_v15 = vadd.f32 %v776_v52, %v775_v40  ;;  %v779_v61 = vmul.f32 %v2013_v3, %v2018_v37  ;;  %v896_v26 = vld [vmem:[%s1605_s28] sm:$0xff] }
 0x132   : > { %v780_v17 = vmul.f32 %v2021_v47, %v764_v10  ;;  %v796_v6 = vadd.f32 %v778_v28, %v777_v43  ;;  %v781_v34 = vmul.f32 %v2229_v13, %v765_v8  ;;  %v769_v1 = vadd.f32 %v745_v56, %v545_v25  ;;  %v898_v43 = vld [vmem:[%s1605_s28 + $0x10] sm:$0xff] }
 0x133   : > { %v770_v58 = vadd.f32 %v754_v55, %v546_v11  ;;  %v782_v29 = vmul.f32 %v2230_v24, %v766_v49  ;;  %v783_v23 = vmul.f32 %v1244_v32, %v767_v5  ;;  %v784_v36 = vmul.f32 %v1246_v4, %v768_v38  ;;  %v897_v5 = vld [vmem:[%s1605_s28 + $0x8] sm:$0xff]  ;;  %v422_v55 = vld [vmem:[%s1610_s30 + $0x18] sm:$0xff] }
 0x134   : > { %791 = vadd.xlane.f32.xlu1 %v790_v35  ;;  %794 = vadd.xlane.f32.xlu0 %v793_v15  ;;  %v799_v30 = vadd.f32 %v780_v17, %v779_v61  ;;  %v785_v3 = vmul.f32 %v1248_v50, %v769_v1  ;;  %v2106_v32 = vshrl.u32 %v854_v44, 7  ;;  %v2108_v19 = vstv %s1075_s15  ;;  %v419_v50 = vld [vmem:[%s1610_s30] sm:$0xff] }
 0x135   : > { %v802_v0 = vadd.f32 %v782_v29, %v781_v34  ;;  %v805_v41 = vadd.f32 %v784_v36, %v783_v23  ;;  %v786_v37 = vmul.f32 %v1250_v57, %v770_v58  ;;  %v423_v15 = vld [vmem:[%s1610_s30 + $0x20] sm:$0xff]  ;;  %v899_v36 = vld [vmem:[%s1605_s28 + $0x18] sm:$0xff] }
 0x136   : > { %v856_v4 = vadd.s32 8, %v2106_v32  ;;  %v864_v33 = vadd.s32 %v2108_v19, %v2106_v32  ;;  %v857_v39 = vadd.s32 16, %v2106_v32  ;;  %v858_v14 = vadd.s32 24, %v2106_v32 }
 0x137   : > { %v808_v47 = vadd.f32 %v786_v37, %v785_v3  ;;  %v859_v31 = vadd.s32 32, %v2106_v32  ;;  %v860_v12 = vadd.s32 40, %v2106_v32  ;;  %v861_v49 = vadd.s32 48, %v2106_v32 }
 0x138   : > { %797 = vadd.xlane.f32.xlu1 %v796_v6  ;;  %800 = vadd.xlane.f32.xlu0 %v799_v30  ;;  %v865_v2 = vadd.s32 %v2108_v19, %v856_v4  ;;  %vm872_vm1 = vcmp.lt.s32.totalorder %v864_v33, 160  ;;  %v866_v21 = vadd.s32 %v2108_v19, %v857_v39  ;;  %v867_v20 = vadd.s32 %v2108_v19, %v858_v14  ;;  %v901_v33 = vld [vmem:[%s1605_s28 + $0x28] sm:$0xff] }
 0x139   : > { %v868_v7 = vadd.s32 %v2108_v19, %v859_v31  ;;  %v869_v17 = vadd.s32 %v2108_v19, %v860_v12  ;;  %v870_v29 = vadd.s32 %v2108_v19, %v861_v49  ;;  %v862_v23 = vadd.s32 56, %v2106_v32 }
 0x13a   : > { %vm873_vm3 = vcmp.lt.s32.totalorder %v865_v2, 160  ;;  %vm874_vm4 = vcmp.lt.s32.totalorder %v866_v21, 160  ;;  %vm875_vm5 = vcmp.lt.s32.totalorder %v867_v20, 160 }
 0x13b   : > { %vm876_vm6 = vcmp.lt.s32.totalorder %v868_v7, 160  ;;  %vm877_vm7 = vcmp.lt.s32.totalorder %v869_v17, 160  ;;  %vm878_vm8 = vcmp.lt.s32.totalorder %v870_v29, 160  ;;  %v871_v4 = vadd.s32 %v2108_v19, %v862_v23 }
 0x13c   : > { %803 = vadd.xlane.f32.xlu1 %v802_v0  ;;  %806 = vadd.xlane.f32.xlu0 %v805_v41  ;;  %v900_v41 = vld [vmem:[%s1605_s28 + $0x20] sm:$0xff] }
 0x13d   : > { %vm879_vm9 = vcmp.lt.s32.totalorder %v871_v4, 160 }
 0x140   : > { %809 = vadd.xlane.f32.xlu1 %v808_v47  ;;  %v424_v47 = vld [vmem:[%s1610_s30 + $0x28] sm:$0xff] }
 0x1ad   : > { %v813_v10 = vpop.xlane.xlu0 %812 }
 0x1ae   : > { %1251 = vrcp.f32 %v813_v10 }
 0x1b1   : > { %v816_v60 = vpop.xlane.xlu1 %815  ;;  %v819_v16 = vpop.xlane.xlu0 %818 }
 0x1b2   : > { %1253 = vrcp.f32 %v816_v60  ;;  %v425_v60 = vld [vmem:[%s1610_s30 + $0x30] sm:$0xff] }
 0x1b3   : > { %1255 = vrcp.f32 %v819_v16 }
 0x1b5   : > { %v822_v42 = vpop.xlane.xlu1 %821  ;;  %v825_v9 = vpop.xlane.xlu0 %824 }
 0x1b6   : > { %1257 = vrcp.f32 %v825_v9 }
 0x1b7   : > { %1259 = vrcp.f32 %v822_v42 }
 0x1b8   : > { %v1252_v51 = vpop.eup %1251 }
 0x1b9   : > { %v828_v57 = vpop.xlane.xlu1 %827  ;;  %v831_v46 = vpop.xlane.xlu0 %830 }
 0x1ba   : > { %1261 = vrcp.f32 %v831_v46 }
 0x1bb   : > { %1263 = vrcp.f32 %v828_v57 }
 0x1bc   : > { %v1254_v48 = vpop.eup %1253 }
 0x1bd   : > { %v834_v27 = vpop.xlane.xlu1 %833  ;;  %v789_v59 = vpop.xlane.xlu0 %788 }
 0x1be   : > { %v836_v45 = vmul.f32 %v1252_v51, %v789_v59  ;;  %v1256_v18 = vpop.eup %1255  ;;  %1265 = vrcp.f32 %v834_v27  ;;  %v902_v51 = vld [vmem:[%s1605_s28 + $0x30] sm:$0xff]  ;;  %v426_v59 = vld [vmem:[%s1610_s30 + $0x38] sm:$0xff] }
 0x1c0   : > { %v880_v22 = vmul.f32 %v836_v45, %v419_v50  ;;  %v1258_v25 = vpop.eup %1257 }
 0x1c1   : > { %v792_v40 = vpop.xlane.xlu1 %791  ;;  %v795_v62 = vpop.xlane.xlu0 %794 }
 0x1c2   : > { %v888_v63 = vsel %vm872_vm1, %v880_v22, 0.0  ;;  %v838_v52 = vmul.f32 %v1254_v48, %v792_v40  ;;  %v840_v8 = vmul.f32 %v1256_v18, %v795_v62  ;;  %v1260_v56 = vpop.eup %1259  ;;  %v903_v48 = vld [vmem:[%s1605_s28 + $0x38] sm:$0xff] }
 0x1c3   : > { %v904_v11 = vadd.f32 %v896_v26, %v888_v63 }
 0x1c4   : > { %v881_v38 = vmul.f32 %v838_v52, %v420_v53  ;;  %v882_v28 = vmul.f32 %v840_v8, %v421_v54  ;;  %v1262_v58 = vpop.eup %1261 }
 0x1c5   : > { %913 = vst.msk [vmem:[%s1605_s28] sm:$0xff] %vm912_vm2, %v904_v11  ;;  %v798_v35 = vpop.xlane.xlu1 %797  ;;  %v801_v61 = vpop.xlane.xlu0 %800 }
 0x1c6   : > { %v889_v6 = vsel %vm873_vm3, %v881_v38, 0.0  ;;  %v890_v13 = vsel %vm874_vm4, %v882_v28, 0.0  ;;  %v842_v34 = vmul.f32 %v1260_v56, %v798_v35  ;;  %v844_v1 = vmul.f32 %v1258_v25, %v801_v61  ;;  %v1264_v37 = vpop.eup %1263 }
 0x1c7   : > { %v905_v30 = vadd.f32 %v897_v5, %v889_v6  ;;  %v906_v24 = vadd.f32 %v898_v43, %v890_v13 }
 0x1c8   : > { %v883_v0 = vmul.f32 %v842_v34, %v422_v55  ;;  %v884_v3 = vmul.f32 %v844_v1, %v423_v15  ;;  %v1266_v50 = vpop.eup %1265 }
 0x1c9   : > { %914 = vst.msk [vmem:[%s1605_s28 + $0x8] sm:$0xff] %vm912_vm2, %v905_v30  ;;  %915 = vst.msk [vmem:[%s1605_s28 + $0x10] sm:$0xff] %vm912_vm2, %v906_v24  ;;  %v804_v10 = vpop.xlane.xlu1 %803  ;;  %v807_v16 = vpop.xlane.xlu0 %806 }
 0x1ca   : > { %v891_v44 = vsel %vm875_vm5, %v883_v0, 0.0  ;;  %v892_v42 = vsel %vm876_vm6, %v884_v3, 0.0  ;;  %v846_v9 = vmul.f32 %v1264_v37, %v804_v10  ;;  %v848_v32 = vmul.f32 %v1262_v58, %v807_v16 }
 0x1cb   : > { %v907_v57 = vadd.f32 %v899_v36, %v891_v44  ;;  %v908_v46 = vadd.f32 %v900_v41, %v892_v42 }
 0x1cc   : > { %v885_v39 = vmul.f32 %v846_v9, %v424_v47  ;;  %v886_v27 = vmul.f32 %v848_v32, %v425_v60 }
 0x1cd   : > { %916 = vst.msk [vmem:[%s1605_s28 + $0x18] sm:$0xff] %vm912_vm2, %v907_v57  ;;  %917 = vst.msk [vmem:[%s1605_s28 + $0x20] sm:$0xff] %vm912_vm2, %v908_v46  ;;  %v810_v14 = vpop.xlane.xlu1 %809 }
 0x1ce   : > { %v893_v31 = vsel %vm877_vm7, %v885_v39, 0.0  ;;  %v894_v45 = vsel %vm878_vm8, %v886_v27, 0.0  ;;  %v850_v2 = vmul.f32 %v1266_v50, %v810_v14 }
 0x1cf   : > { %v909_v19 = vadd.f32 %v901_v33, %v893_v31  ;;  %v910_v21 = vadd.f32 %v902_v51, %v894_v45 }
 0x1d0   : > { %v887_v26 = vmul.f32 %v850_v2, %v426_v59 }
 0x1d1   : > { %918 = vst.msk [vmem:[%s1605_s28 + $0x28] sm:$0xff] %vm912_vm2, %v909_v19  ;;  %919 = vst.msk [vmem:[%s1605_s28 + $0x30] sm:$0xff] %vm912_vm2, %v910_v21 }
 0x1d2   : > { %v895_v22 = vsel %vm879_vm9, %v887_v26, 0.0 }
 0x1d3   : > { %v911_v18 = vadd.f32 %v903_v48, %v895_v22 }
 0x1d5   : > { %920 = vst.msk [vmem:[%s1605_s28 + $0x38] sm:$0xff] %vm912_vm2, %v911_v18 }
 0x1d6 PF: > { %s19_s19 = sadd.s32 1, %s1393_s19   ;;  %s2231_s12 = smov %s1369_s13 }
 0x1d7   : > { %p16_p4 = scmp.ge.s32.totalorder %s19_s19, 6   ;;  %s2232_s13 = smov %s1373_s14 }
 0x1d8   : > { %s2233_s14 = smov %s1489_s4  ;;  %s2234_s15 = smov %s1385_s17 }
 0x1d9   : > { %s2235_s16 = smov %s1389_s18  ;;  %s2236_s17 = smov %s2239_s20 }
 0x1da   : > { %s2237_s18 = smov %s2243_s21  ;;  %18 = sbr.rel (!%p16_p4) target bundleno = 7 (0x7), region = 92 }
 0x1e1   :  { %943 = vsyncpa [#allocation3], 1 }
 0x1e2   :  { %945 = vsyncpa [#allocation3 + $0x1], 1 }
 0x1e3   :  { %946 = vsyncpa [#allocation5], 1 }
 0x1e4   :  { %948 = vsyncpa [#allocation5 + $0x1], 1 }

</bundles_post_ra>
